<compile_context>
chip_gen: v6e
topology: v6e:2x2x1
jax: 0.10.0
libtpu: 0.0.40
codegen_flags: <defaults>
</compile_context>

<pallas_src>
import math

import jax
import jax.numpy as jnp
from jax.experimental import pallas as pl
from jax.experimental.pallas import tpu as pltpu


def mlp_kernel(x_ref, w1_ref, b1_ref, w2_ref, b2_ref, w3_ref, b3_ref, o_ref):
    """Fused 3-layer MLP on one (TILE_B, D) batch tile.

    x_ref : (TILE_B, D) f32   streamed per grid step (double-buffered)
    w1_ref: (D, H)     bf16   resident (pre-transposed to in x out)
    w2_ref: (D, H)     bf16   resident (pre-transposed; module uses in_dim == D)
    w3_ref: (O, H)     bf16   resident (kept in PyTorch (out, in) layout)
    b*_ref: f32 biases        resident
    o_ref : (O, TILE_B) f32   batch on the lane axis -> lane-dense stores
    """
    xb = x_ref[...].astype(jnp.bfloat16)

    h1 = jnp.dot(xb, w1_ref[...], preferred_element_type=jnp.float32)      # (TB, H) f32
    h1 = jnp.maximum(h1 + b1_ref[...], 0.0)                                # f32 epilogue

    h2 = jnp.dot(h1.astype(jnp.bfloat16), w2_ref[...],
                 preferred_element_type=jnp.float32)                       # (TB, H) f32
    h2 = jnp.maximum(h2 + b2_ref[...], 0.0)

    # Last layer: (O, H) x (TB, H) contracted on H -> (O, TB).  Puts batch on the lane
    # axis so the O=1 output is written with dense (unmasked) stores.
    y = jax.lax.dot_general(w3_ref[...], h2.astype(jnp.bfloat16),
                            (((1,), (1,)), ((), ())),
                            preferred_element_type=jnp.float32)            # (O, TB) f32
    o_ref[...] = (y + b3_ref[...]).astype(o_ref.dtype)


def prepare_params(params, weight_dtype=jnp.bfloat16):
    """One-time layout/dtype preparation (do NOT call per forward pass)."""
    return dict(
        w1t=jnp.asarray(params["w1"].T, weight_dtype),        # (D, H)
        w2t=jnp.asarray(params["w2"].T, weight_dtype),        # (D, H)
        w3=jnp.asarray(params["w3"], weight_dtype),           # (O, H)  keep (out, in)
        b1=jnp.asarray(params["b1"], jnp.float32)[None, :],   # (1, H)
        b2=jnp.asarray(params["b2"], jnp.float32)[None, :],   # (1, H)
        b3=jnp.asarray(params["b3"], jnp.float32)[:, None],   # (O, 1)
    )


def mlp_forward(x, prep, *, tile_b=256):
    """Run the fused MLP Pallas kernel.  x: (B, D) f32; returns (B, O) f32."""
    B, D = x.shape
    H = prep["w1t"].shape[1]
    O = prep["w3"].shape[0]
    assert tile_b % 128 == 0, "tile_b must be a multiple of the 128-lane width"

    # Pad batch so every tile is full; padded rows are zeros and are sliced off below.
    b_pad = pl.cdiv(B, tile_b) * tile_b
    if b_pad != B:
        x = jnp.pad(x, ((0, b_pad - B), (0, 0)))
    grid = (b_pad // tile_b,)

    # Constant index_map => block never changes => weights/biases stay resident in VMEM.
    def resident(a):
        return pl.BlockSpec(a.shape, lambda i: (0,) * a.ndim)

    # Explicit VMEM budget from tile sizes (resident weights + double-buffered x / out).
    weight_bytes = sum(int(prep[k].size) * prep[k].dtype.itemsize
                       for k in ("w1t", "w2t", "w3", "b1", "b2", "b3"))
    stream_bytes = 2 * tile_b * D * 4 + 2 * O * tile_b * 4
    vmem_limit = int(min(max(4 * (weight_bytes + stream_bytes), 32 * 2**20), 48 * 2**20))

    out = pl.pallas_call(
        mlp_kernel,
        out_shape=jax.ShapeDtypeStruct((O, b_pad), jnp.float32),
        grid=grid,
        in_specs=[
            pl.BlockSpec((tile_b, D), lambda i: (i, 0)),   # x streams over the batch
            resident(prep["w1t"]),
            resident(prep["b1"]),
            resident(prep["w2t"]),
            resident(prep["b2"]),
            resident(prep["w3"]),
            resident(prep["b3"]),
        ],
        out_specs=pl.BlockSpec((O, tile_b), lambda i: (0, i)),   # lane-dense output
        compiler_params=pltpu.CompilerParams(
            dimension_semantics=("parallel",),     # batch axis shardable across TCs
            vmem_limit_bytes=vmem_limit,
        ),
    )(x, prep["w1t"], prep["b1"], prep["w2t"], prep["b2"], prep["w3"], prep["b3"])

    return out[:, :B].T                                          # (B, O)


def init_linear(key, in_dim, out_dim):
    """kaiming_uniform_(a=sqrt(5)) on weight + uniform(+-1/sqrt(fan_in)) on bias."""
    kw, kb = jax.random.split(key)
    bound = 1.0 / math.sqrt(in_dim)
    w = jax.random.uniform(kw, (out_dim, in_dim), jnp.float32, -bound, bound)
    b = jax.random.uniform(kb, (out_dim,), jnp.float32, -bound, bound)
    return w, b


def reference_mlp_f32(x, params):
    """Pure f32 reference (module semantics)."""
    h = jnp.maximum(x @ params["w1"].T + params["b1"], 0.0)
    h = jnp.maximum(h @ params["w2"].T + params["b2"], 0.0)
    return h @ params["w3"].T + params["b3"]


def reference_mlp_bf16(x, params):
    """Reference matching the kernel numerics: bf16 matmul inputs, f32 accum/epilogue."""
    bf = jnp.bfloat16
    w1t = params["w1"].T.astype(bf)
    w2t = params["w2"].T.astype(bf)
    w3t = params["w3"].T.astype(bf)
    h = jnp.dot(x.astype(bf), w1t, preferred_element_type=jnp.float32) + params["b1"]
    h = jnp.maximum(h, 0.0)
    h = jnp.dot(h.astype(bf), w2t, preferred_element_type=jnp.float32) + params["b2"]
    h = jnp.maximum(h, 0.0)
    return jnp.dot(h.astype(bf), w3t, preferred_element_type=jnp.float32) + params["b3"]


if __name__ == "__main__":
    # Small demo shapes.  D == H so the module's layer-2 in_dim quirk type-checks, and
    # D = H = 128 keeps feature dims lane-aligned.  B = 512 with TILE_B = 256 exercises
    # the batch grid (2 tiles) while staying small.
    B, INPUT_DIM, HIDDEN, OUTPUT_DIM = 512, 128, 128, 1
    TILE_B = 256

    key = jax.random.PRNGKey(0)
    kx, k1, k2, k3 = jax.random.split(key, 4)

    x = jax.random.normal(kx, (B, INPUT_DIM), jnp.float32)

    w1, b1 = init_linear(k1, INPUT_DIM, HIDDEN)     # Linear(input_dim, hidden[0])
    w2, b2 = init_linear(k2, INPUT_DIM, HIDDEN)     # Linear(input_dim, hidden[1]) (module quirk)
    w3, b3 = init_linear(k3, HIDDEN, OUTPUT_DIM)    # Linear(hidden[-1], output_dim)
    params = {"w1": w1, "b1": b1, "w2": w2, "b2": b2, "w3": w3, "b3": b3}

    prep = prepare_params(params)                   # one-time layout/dtype prep
    out = jax.block_until_ready(mlp_forward(x, prep, tile_b=TILE_B))

    assert out.shape == (B, OUTPUT_DIM)
    ref_matched = reference_mlp_bf16(x, params)     # same numerics as the kernel
    ref_f32 = reference_mlp_f32(x, params)          # module-exact f32 semantics
    assert jnp.allclose(out, ref_matched, atol=5e-3, rtol=5e-3), "mismatch vs bf16-matched reference"
    assert jnp.allclose(out, ref_f32, atol=5e-2, rtol=5e-2), "mismatch vs f32 reference"

    print("KERNEL_OK")
</pallas_src>

<mosaic_0001>
module attributes {stable_mosaic.version = 11 : i64} {
  func.func @mlp_kernel(%arg0: i32, %arg1: memref<256x128xf32, #tpu.memory_space<vmem>>, %arg2: memref<128x128xbf16, #tpu.memory_space<vmem>>, %arg3: memref<1x128xf32, #tpu.memory_space<vmem>>, %arg4: memref<128x128xbf16, #tpu.memory_space<vmem>>, %arg5: memref<1x128xf32, #tpu.memory_space<vmem>>, %arg6: memref<1x128xbf16, #tpu.memory_space<vmem>>, %arg7: memref<1x1xf32, #tpu.memory_space<vmem>>, %arg8: memref<1x256xf32, #tpu.memory_space<vmem>>) attributes {dimension_semantics = [#tpu.dimension_semantics<parallel>], iteration_bounds = array<i64: 2>, scalar_prefetch = 0 : i64, scratch_operands = 0 : i64, tpu.core_type = #tpu.core_type<tc>, window_params = [{transform_indices = @transform_0, window_bounds = array<i64: 256, 128>}, {pipeline_mode = #tpu.pipeline_mode<synchronous>, transform_indices = @transform_1, window_bounds = array<i64: 128, 128>}, {pipeline_mode = #tpu.pipeline_mode<synchronous>, transform_indices = @transform_2, window_bounds = array<i64: 1, 128>}, {pipeline_mode = #tpu.pipeline_mode<synchronous>, transform_indices = @transform_3, window_bounds = array<i64: 128, 128>}, {pipeline_mode = #tpu.pipeline_mode<synchronous>, transform_indices = @transform_4, window_bounds = array<i64: 1, 128>}, {pipeline_mode = #tpu.pipeline_mode<synchronous>, transform_indices = @transform_5, window_bounds = array<i64: 1, 128>}, {pipeline_mode = #tpu.pipeline_mode<synchronous>, transform_indices = @transform_6, window_bounds = array<i64: 1, 1>}, {transform_indices = @transform_7, window_bounds = array<i64: 1, 256>}]} {
    %c0 = arith.constant 0 : index
    %c0_0 = arith.constant 0 : index
    %0 = vector.load %arg1[%c0, %c0_0] : memref<256x128xf32, #tpu.memory_space<vmem>>, vector<256x128xf32>
    %1 = arith.truncf %0 : vector<256x128xf32> to vector<256x128xbf16>
    %c0_1 = arith.constant 0 : index
    %c0_2 = arith.constant 0 : index
    %2 = vector.load %arg2[%c0_1, %c0_2] : memref<128x128xbf16, #tpu.memory_space<vmem>>, vector<128x128xbf16>
    %cst = arith.constant dense<0.000000e+00> : vector<256x128xf32>
    %3 = tpu.matmul %1, %2, %cst {dimension_numbers = #tpu.dot_dimension_numbers<[1], [0], [0], [1], [0, 0, 1, 1], [], []>} : vector<256x128xbf16>, vector<128x128xbf16>, vector<256x128xf32> -> vector<256x128xf32>
    %c0_3 = arith.constant 0 : index
    %c0_4 = arith.constant 0 : index
    %4 = vector.load %arg3[%c0_3, %c0_4] : memref<1x128xf32, #tpu.memory_space<vmem>>, vector<1x128xf32>
    %5 = vector.broadcast %4 : vector<1x128xf32> to vector<256x128xf32>
    %6 = arith.addf %3, %5 : vector<256x128xf32>
    %cst_5 = arith.constant 0.000000e+00 : f32
    %7 = vector.broadcast %cst_5 : f32 to vector<256x128xf32>
    %8 = arith.maximumf %6, %7 : vector<256x128xf32>
    %9 = arith.truncf %8 : vector<256x128xf32> to vector<256x128xbf16>
    %c0_6 = arith.constant 0 : index
    %c0_7 = arith.constant 0 : index
    %10 = vector.load %arg4[%c0_6, %c0_7] : memref<128x128xbf16, #tpu.memory_space<vmem>>, vector<128x128xbf16>
    %cst_8 = arith.constant dense<0.000000e+00> : vector<256x128xf32>
    %11 = tpu.matmul %9, %10, %cst_8 {dimension_numbers = #tpu.dot_dimension_numbers<[1], [0], [0], [1], [0, 0, 1, 1], [], []>} : vector<256x128xbf16>, vector<128x128xbf16>, vector<256x128xf32> -> vector<256x128xf32>
    %c0_9 = arith.constant 0 : index
    %c0_10 = arith.constant 0 : index
    %12 = vector.load %arg5[%c0_9, %c0_10] : memref<1x128xf32, #tpu.memory_space<vmem>>, vector<1x128xf32>
    %13 = vector.broadcast %12 : vector<1x128xf32> to vector<256x128xf32>
    %14 = arith.addf %11, %13 : vector<256x128xf32>
    %cst_11 = arith.constant 0.000000e+00 : f32
    %15 = vector.broadcast %cst_11 : f32 to vector<256x128xf32>
    %16 = arith.maximumf %14, %15 : vector<256x128xf32>
    %c0_12 = arith.constant 0 : index
    %c0_13 = arith.constant 0 : index
    %17 = vector.load %arg6[%c0_12, %c0_13] : memref<1x128xbf16, #tpu.memory_space<vmem>>, vector<1x128xbf16>
    %18 = arith.truncf %16 : vector<256x128xf32> to vector<256x128xbf16>
    %cst_14 = arith.constant dense<0.000000e+00> : vector<1x256xf32>
    %19 = tpu.matmul %17, %18, %cst_14 {dimension_numbers = #tpu.dot_dimension_numbers<[1], [1], [0], [0], [0, 0, 1, 0], [], []>} : vector<1x128xbf16>, vector<256x128xbf16>, vector<1x256xf32> -> vector<1x256xf32>
    %c0_15 = arith.constant 0 : index
    %c0_16 = arith.constant 0 : index
    %20 = vector.load %arg7[%c0_15, %c0_16] : memref<1x1xf32, #tpu.memory_space<vmem>>, vector<1x1xf32>
    %21 = vector.broadcast %20 : vector<1x1xf32> to vector<1x256xf32>
    %22 = arith.addf %19, %21 : vector<1x256xf32>
    %c0_17 = arith.constant 0 : index
    %c0_18 = arith.constant 0 : index
    %23 = vector.load %arg8[%c0_17, %c0_18] : memref<1x256xf32, #tpu.memory_space<vmem>>, vector<1x256xf32>
    tpu.vector_store %arg8[%c0_17, %c0_18], %22 {strides = array<i32>} : memref<1x256xf32, #tpu.memory_space<vmem>>, vector<1x256xf32>,
    return
  }
  func.func @transform_0(%arg0: i32) -> (i32, i32) {
    %c0_i32 = arith.constant 0 : i32
    %c0_i32_0 = arith.constant 0 : i32
    return %arg0, %c0_i32 : i32, i32
  }
  func.func @transform_1(%arg0: i32) -> (i32, i32) {
    %c0_i32 = arith.constant 0 : i32
    %c0_i32_0 = arith.constant 0 : i32
    %c0_i32_1 = arith.constant 0 : i32
    return %c0_i32, %c0_i32_0 : i32, i32
  }
  func.func @transform_2(%arg0: i32) -> (i32, i32) {
    %c0_i32 = arith.constant 0 : i32
    %c0_i32_0 = arith.constant 0 : i32
    %c0_i32_1 = arith.constant 0 : i32
    return %c0_i32, %c0_i32_0 : i32, i32
  }
  func.func @transform_3(%arg0: i32) -> (i32, i32) {
    %c0_i32 = arith.constant 0 : i32
    %c0_i32_0 = arith.constant 0 : i32
    %c0_i32_1 = arith.constant 0 : i32
    return %c0_i32, %c0_i32_0 : i32, i32
  }
  func.func @transform_4(%arg0: i32) -> (i32, i32) {
    %c0_i32 = arith.constant 0 : i32
    %c0_i32_0 = arith.constant 0 : i32
    %c0_i32_1 = arith.constant 0 : i32
    return %c0_i32, %c0_i32_0 : i32, i32
  }
  func.func @transform_5(%arg0: i32) -> (i32, i32) {
    %c0_i32 = arith.constant 0 : i32
    %c0_i32_0 = arith.constant 0 : i32
    %c0_i32_1 = arith.constant 0 : i32
    return %c0_i32, %c0_i32_0 : i32, i32
  }
  func.func @transform_6(%arg0: i32) -> (i32, i32) {
    %c0_i32 = arith.constant 0 : i32
    %c0_i32_0 = arith.constant 0 : i32
    %c0_i32_1 = arith.constant 0 : i32
    return %c0_i32, %c0_i32_0 : i32, i32
  }
  func.func @transform_7(%arg0: i32) -> (i32, i32) {
    %c0_i32 = arith.constant 0 : i32
    %c0_i32_0 = arith.constant 0 : i32
    return %c0_i32, %arg0 : i32, i32
  }
}

</mosaic_0001>

<bundles_post_ra>
// kernel: tpu_custom_call.1
= control target key start
LH: loop header
LB: loop body
LE: loop exit
PB: predicated region body
PF: predicated region fallthrough
CT: control target
= control target key end

     0   :  { %s1931_s0 = inlined_call_operand.hbm [shape: f32[512,128], index: 0, kind: input, shape index: {}]   ;;  %s1932_s1 = inlined_call_operand.hbm [shape: bf16[128,128], index: 1, kind: input, shape index: {}]   ;;  %s1933_s2 = inlined_call_operand.vmem [shape: f32[1,128], index: 2, kind: input, shape index: {}]   ;;  %s1934_s3 = inlined_call_operand.hbm [shape: bf16[128,128], index: 3, kind: input, shape index: {}]   ;;  %s1935_s4 = inlined_call_operand.vmem [shape: f32[1,128], index: 4, kind: input, shape index: {}]   ;;  %s1936_s5 = inlined_call_operand.vmem [shape: bf16[1,128], index: 5, kind: input, shape index: {}]   ;;  %s1937_s6 = inlined_call_operand.<no memory space> [shape: f32[1,1], index: 6, kind: input, shape index: {}]   ;;  %s1938_s7 = inlined_call_operand.hbm [shape: f32[1,512], index: 7, kind: output, shape index: {}]  }
   0x1   :  { %v12_v0 = vstv %s1937_s6 }
   0x2   :  { %13 = vst [vmem:[#allocation2] sm:$0x1] %v12_v0 }
   0x3   :  { %14 = vsyncpa [#allocation4], 0 }
   0x4   :  { %16 = vsyncpa [#allocation4 + $0x1], 0 }
   0x5   :  { %17 = vsyncpa [#allocation7], 0 }
   0x6   :  { %18 = vsyncpa [#allocation5], 0 }
   0x7   :  { %20 = vsyncpa [#allocation5 + $0x1], 0  ;;  %s1611_s26 = smov 0   ;;  %s1613_s27 = smov 0  }
   0x8   :  { %s1615_s28 = smov 0   ;;  %s1617_s29 = smov 0  }
   0x9 LB: > { %s1632_s6 = sadd.s32 4294967295, %s1556_s29   ;;  %s1118_s30 = sadd.s32 4294967294, %s1556_s29   ;;  %s1556_s29 = sphi %s1617_s29, %s1960_s29   ;;  %s1552_s28 = sphi %s1615_s28, %s1959_s28   ;;  %s1548_s27 = sphi %s1613_s27, %s1958_s27   ;;  %s1544_s26 = sphi %s1611_s26, %s1957_s26  }
   0xa   : > { %p46_p0 = scmp.ne.s32.totalorder %s1548_s27, %s1544_s26  ;;  %p1939_p1 = scmp.eq.s32.totalorder %s1632_s6, 0 }
   0xb   : > { %p202_p3 = scmp.eq.s32.totalorder %s1118_s30, 1  ;;  %p1119_p5 = scmp.ge.s32.totalorder %s1556_s29, 1 }
   0xc   : > { %p1641_p4 = por %p1939_p1, %p46_p0  ;;  %p209_p7 = scmp.lt.s32.totalorder %s1556_s29, 3 }
   0xd   : > { %p1646_p6 = por %p202_p3, %p46_p0  ;;  %s1558_s11 = smov [#allocation6]  }
   0xe   : > { %s1943_s8 = scalar_select %p1641_p4, 1, 0 }
   0xf   : > { %s1944_s9 = scalar_select %p1646_p6, 1, 0 }
  0x10   : > { %p1651_p8 = pnand %p1119_p5, %p209_p7  ;;  %s221_s12 = sshll.u32 %s1558_s11, 4  ;;  %s222_s12 = int_to_ptr.vmem [resolvable:$true] %s221_s12 }
  0x11   : > { %s1559_s14 = smov [#allocation8]   ;;  %s1419_s16 = scalar_lea.vmem %s222_s12, 1024 }
  0x12   : > { %s1945_s10 = scalar_select %p1651_p8, 1, 0 }
  0x13   : > { %p1330_p9 = pneg %p1651_p8  ;;  %s237_s15 = sshll.u32 %s1559_s14, 4  ;;  %s238_s15 = int_to_ptr.vmem [resolvable:$true] %s237_s15 }
  0x14   : > { %p1420_p13 = scmp.ne.s32.totalorder %s222_s12, %s1419_s16  ;;  %p1427_p5 = scmp.lt.s32.totalorder %s222_s12, %s222_s12 }
  0x15   : > { %p1660_p11 = pnand %p1330_p9, %p1939_p1  ;;  %p1428_p7 = scmp.lt.s32.totalorder %s1419_s16, %s1419_s16 }
  0x17   : > { %p1410_p12 = pneg %p1660_p11  ;;  %p1429_p10 = por %p1428_p7, %p1427_p5 }
  0x19   : > { %p1422_p0 = pnand %p1420_p13, %p1410_p12 }
  0x1b   : > { %p1423_p3 = pneg %p1422_p0 }
  0x1d   : > { %p1430_p9 = pnand %p1429_p10, %p1423_p3 }
  0x1f   : > { %1433 = shalt.err (!%p1430_p9)
}
  0x20   : > { %s1560_s17 = smov 64   ;;  %s1561_s18 = smov 4  }
  0x21   : > { %1333 = dma.hbm_to_vmem [thread:$0]  (!%p1660_p11), %s1932_s1, 1024, %s222_s12, [#allocation7], %s1560_s17, %s1560_s17, %s1561_s18  }
  0x22   : > { %s1445_s21 = scalar_lea.vmem %s238_s15, 1024  ;;  %p1453_p2 = scmp.lt.s32.totalorder %s238_s15, %s238_s15 }
  0x23   : > { %p1446_p1 = scmp.ne.s32.totalorder %s238_s15, %s1445_s21  ;;  %p1454_p6 = scmp.lt.s32.totalorder %s1445_s21, %s1445_s21 }
  0x25   : > { %p1448_p13 = pnand %p1446_p1, %p1410_p12  ;;  %p1455_p5 = por %p1454_p6, %p1453_p2 }
  0x27   : > { %p1449_p0 = pneg %p1448_p13 }
  0x29   : > { %p1456_p10 = pnand %p1455_p5, %p1449_p0 }
  0x2b   : > { %1459 = shalt.err (!%p1456_p10)
}
  0x2c   : > { %1336 = dma.hbm_to_vmem [thread:$0]  (!%p1660_p11), %s1934_s3, 1024, %s238_s15, [#allocation7], %s1560_s17, %s1560_s17, %s1561_s18  }
  0x2d   : > { %s1683_s24 = sadd.s32 1, %s1556_s29   ;;  %s33_s25 = sadd.s32 1, %s1552_s28 }
  0x2e   : > { %s30_s30 = ssub.s32 %s1556_s29, %s1683_s24  ;;  %p40_p1 = scmp.ne.s32.totalorder %s1552_s28, %s1548_s27 }
  0x2f   : > { %p31_p2 = scmp.eq.s32.totalorder %s30_s30, 0  ;;  %p41_p6 = scmp.eq.s32.totalorder %s1556_s29, 0 }
  0x30   : > { %p1947_p12 = scmp.eq.s32.totalorder %s1632_s6, 1  ;;  %p1347_p7 = scmp.lt.s32.totalorder %s1556_s29, 2 }
  0x31   : > { %s1699_s12 = scalar_select %p31_p2, %s1552_s28, %s33_s25  }
  0x32   : > { %p1693_p3 = por %p1947_p12, %p40_p1  ;;  %p42_p9 = por %p41_p6, %p40_p1 }
  0x33   : > { %s260_s13 = sand.u32 1, %s1552_s28   ;;  %s1154_s15 = sshll.u32 %s1556_s29, 12 }
  0x34   : > { %s1948_s11 = scalar_select %p1693_p3, 1, 0 }
  0x35   : > { %s1123_s14 = sshll.u32 %s260_s13, 8  ;;  %s1706_s18 = scalar_lea.hbm %s1931_s0, %s1154_s15 }
  0x36   : > { %s264_s19 = scalar_lea.vmem [#allocation3], %s1123_s14  ;;  %p1710_p11 = pnand %p1347_p7, %p42_p9 }
  0x37   : > { %s271_s20 = sshll.u32 %s264_s19, 4  ;;  %s1714_s22 = scalar_lea.sflag [#allocation4], %s260_s13  ;;  %s1708_s20 = int_to_ptr.vmem [resolvable:$true] %s271_s20 }
  0x38   : > { %s1460_s23 = scalar_lea.hbm %s1706_s18, 4096  ;;  %p1462_p0 = pneg %p1710_p11 }
  0x39   : > { %p1461_p13 = scmp.ne.s32.totalorder %s1706_s18, %s1460_s23  ;;  %s1465_s14 = scalar_lea.hbm %s1931_s0, 8192 }
  0x3a   : > { %p1466_p1 = scmp.lt.s32.totalorder %s1706_s18, %s1931_s0  ;;  %p1467_p2 = scmp.lt.s32.totalorder %s1465_s14, %s1460_s23 }
  0x3b   : > { %p1463_p5 = pnand %p1462_p0, %p1461_p13 }
  0x3c   : > { %p1468_p6 = por %p1467_p2, %p1466_p1 }
  0x3d   : > { %p1464_p10 = pneg %p1463_p5 }
  0x3f   : > { %p1469_p12 = pnand %p1468_p6, %p1464_p10 }
  0x41   : > { %1472 = shalt.err (!%p1469_p12)
}
  0x42   : > { %s1473_s13 = scalar_lea.vmem %s1708_s20, 4096  ;;  %s1562_s17 = smov [#allocation3]  }
  0x43   : > { %p1474_p7 = scmp.ne.s32.totalorder %s1708_s20, %s1473_s13  ;;  %s1478_s19 = sshll.u32 %s1562_s17, 4  ;;  %s1479_s19 = int_to_ptr.vmem [resolvable:$false] %s1478_s19 }
  0x44   : > { %s1480_s25 = scalar_lea.vmem %s1479_s19, 8192  ;;  %p1481_p5 = scmp.lt.s32.totalorder %s1708_s20, %s1479_s19 }
  0x45   : > { %p1476_p9 = pnand %p1474_p7, %p1462_p0  ;;  %p1482_p3 = scmp.lt.s32.totalorder %s1480_s25, %s1473_s13 }
  0x47   : > { %p1477_p13 = pneg %p1476_p9  ;;  %p1483_p4 = por %p1482_p3, %p1481_p5 }
  0x49   : > { %p1484_p8 = pnand %p1483_p4, %p1477_p13 }
  0x4b   : > { %1487 = shalt.err (!%p1484_p8)
}
  0x4c   : > { %s1563_s23 = smov 128   ;;  %s1564_s30 = smov 8  }
  0x4d   : > { %1340 = dma.hbm_to_vmem [thread:$0]  (!%p1710_p11), %s1706_s18, 4096, %s1708_s20, %s1714_s22, %s1563_s23, %s1563_s23, %s1564_s30  }
  0x4e   : > { %p1950_p0 = scmp.ne.s32.totalorder %s1945_s10, 0 }
  0x4f   : > { %s1738_s14 = sand.u32 (!%p1950_p0), 1, %s1548_s27   ;;  %p1951_p4 = scmp.ne.s32.totalorder (!%p1950_p0), %s1943_s8, 0 }
  0x50   : > { %283 = sbr.rel (%p1950_p0) target bundleno = 867 (0x363), region = 48  ;;  %s1127_s15 = sshll.u32 (!%p1950_p0), %s1738_s14, 8 }
  0x51   : > { %s286_s16 = scalar_lea.sflag (!%p1950_p0), [#allocation4], %s1738_s14  ;;  %s1742_s13 = scalar_lea.vmem (!%p1950_p0), [#allocation3], %s1127_s15 }
  0x55   : > { %1531 = dma.done.wait (%p1951_p4), %s286_s16, 4096  }
  0x56   : > { %1533 = vsyncadd (%p1951_p4), %s286_s16, 4294963200  ;;  %p1952_p8 = scmp.eq.s32.totalorder %s1632_s6, 0 }
  0x58   : > { %1535 = dma.done.wait (%p1952_p8), [#allocation7], 2048   ;;  %p1953_p3 = pmov %p1952_p8 }
  0x59   : > { %v1392_v1 = vld [vmem:[#allocation6 + $0x38] sm:$0xff]   ;;  %v1393_v2 = vld [vmem:[#allocation6 + $0x30] sm:$0xff]   ;;  %v1394_v3 = vld [vmem:[#allocation6 + $0x28] sm:$0xff]   ;;  %s1130_s17 = sshll.u32 %s1738_s14, 1  ;;  %s1155_s19 = sshll.u32 %s1632_s6, 5 }
  0x5a   : > { %1537 = vsyncadd (%p1953_p3), [#allocation7], 4294965248  ;;  %1222 = vmatprep.subr.bf16.mxu0 %v1392_v1  ;;  %v1395_v4 = vld [vmem:[#allocation6 + $0x20] sm:$0xff]   ;;  %v332_v6 = vld [vmem:[%s1742_s13 + $0x8] sm:$0xff]  ;;  %s327_s25 = scalar_lea.vmem [#allocation9], %s1130_s17  ;;  %s1027_s16 = scalar_lea.hbm %s1938_s7, %s1155_s19 }
  0x5b   : > { %1223 = vmatpush3.bf16.msra.mxu0 %v1392_v1  ;;  %v331_v5 = vld [vmem:[%s1742_s13] sm:$0xff]  ;;  %v1396_v8 = vld [vmem:[#allocation6 + $0x18] sm:$0xff]   ;;  %v1397_v9 = vld [vmem:[#allocation6 + $0x10] sm:$0xff]   ;;  %s1029_s23 = sshll.u32 %s327_s25, 4  ;;  %p1954_p10 = scmp.ne.s32.totalorder %s1948_s11, 0  ;;  %s1030_s23 = int_to_ptr.vmem [resolvable:$true] %s1029_s23 }
  0x5c   : > { %1224 = vmatprep.subr.bf16.mxu0 %v1393_v2  ;;  %v363_v7 = vpack.c.bf16 %v332_v6, %v331_v5  ;;  %v1398_v10 = vld [vmem:[#allocation6 + $0x8] sm:$0xff]   ;;  %v1400_v11 = vld [vmem:[#allocation8 + $0x38] sm:$0xff]   ;;  %v1401_v12 = vld [vmem:[#allocation8 + $0x30] sm:$0xff]   ;;  %s1488_s8 = scalar_lea.vmem %s1030_s23, 32  ;;  %s1567_s10 = smov [#allocation9]  }
  0x5d   : > { %1270 = vmatprep.subr.bf16.mxu1 %v1400_v11  ;;  %v1399_v13 = vld [vmem:[#allocation6] sm:$0xff]   ;;  %v1402_v14 = vld [vmem:[#allocation8 + $0x28] sm:$0xff]   ;;  %v333_v15 = vld [vmem:[%s1742_s13 + $0x10] sm:$0xff]  ;;  %p1489_p11 = scmp.ne.s32.totalorder %s1030_s23, %s1488_s8  ;;  %s1492_s18 = sshll.u32 %s1567_s10, 4  ;;  %s1493_s18 = int_to_ptr.vmem [resolvable:$false] %s1492_s18 }
  0x5e   : > { %1238 = vmatprep.mubr.bf16.mxu0 %v363_v7  ;;  %1271 = vmatpush3.bf16.msra.mxu1 %v1400_v11  ;;  %v334_v16 = vld [vmem:[%s1742_s13 + $0x18] sm:$0xff]  ;;  %v1403_v17 = vld [vmem:[#allocation8 + $0x20] sm:$0xff]   ;;  %v336_v19 = vld [vmem:[%s1742_s13 + $0x28] sm:$0xff]  ;;  %s1494_s6 = scalar_lea.vmem %s1493_s18, 64  ;;  %p1495_p6 = scmp.lt.s32.totalorder %s1030_s23, %s1493_s18 }
  0x5f   : > { %1225 = vmatpush3.bf16.msra.mxu0 %v1393_v2  ;;  %1272 = vmatprep.subr.bf16.mxu1 %v1401_v12  ;;  %v335_v18 = vld [vmem:[%s1742_s13 + $0x20] sm:$0xff]  ;;  %v364_v20 = vpack.c.bf16 %v334_v16, %v333_v15  ;;  %v1404_v22 = vld [vmem:[#allocation8 + $0x18] sm:$0xff]   ;;  %v337_v23 = vld [vmem:[%s1742_s13 + $0x30] sm:$0xff]  ;;  %p1490_p1 = pnand %p1489_p11, %p1954_p10  ;;  %p1496_p12 = scmp.lt.s32.totalorder %s1494_s6, %s1488_s8 }
  0x60   : > { %1226 = vmatprep.subr.bf16.mxu0 %v1394_v3  ;;  %v365_v21 = vpack.c.bf16 %v336_v19, %v335_v18  ;;  %v338_v24 = vld [vmem:[%s1742_s13 + $0x38] sm:$0xff]  ;;  %v339_v25 = vld [vmem:[%s1742_s13 + $0x40] sm:$0xff]  ;;  %v340_v26 = vld [vmem:[%s1742_s13 + $0x48] sm:$0xff] }
  0x61   : > { %v366_v27 = vpack.c.bf16 %v338_v24, %v337_v23  ;;  %v367_v28 = vpack.c.bf16 %v340_v26, %v339_v25  ;;  %v341_v29 = vld [vmem:[%s1742_s13 + $0x50] sm:$0xff]  ;;  %v342_v30 = vld [vmem:[%s1742_s13 + $0x58] sm:$0xff]  ;;  %v343_v31 = vld [vmem:[%s1742_s13 + $0x60] sm:$0xff]  ;;  %p1491_p2 = pneg %p1490_p1  ;;  %p1497_p7 = por %p1496_p12, %p1495_p6 }
  0x62   : > { %1273 = vmatpush3.bf16.msra.mxu1 %v1401_v12  ;;  %v344_v32 = vld [vmem:[%s1742_s13 + $0x68] sm:$0xff]  ;;  %v368_v33 = vpack.c.bf16 %v342_v30, %v341_v29  ;;  %v345_v35 = vld [vmem:[%s1742_s13 + $0x70] sm:$0xff]  ;;  %v346_v36 = vld [vmem:[%s1742_s13 + $0x78] sm:$0xff] }
  0x63   : > { %1227 = vmatpush3.bf16.msra.mxu0 %v1394_v3  ;;  %1274 = vmatprep.subr.bf16.mxu1 %v1402_v14  ;;  %v369_v34 = vpack.c.bf16 %v344_v32, %v343_v31  ;;  %v347_v37 = vld [vmem:[%s1742_s13 + $0x80] sm:$0xff]  ;;  %v348_v38 = vld [vmem:[%s1742_s13 + $0x88] sm:$0xff]  ;;  %v370_v39 = vpack.c.bf16 %v346_v36, %v345_v35  ;;  %v349_v41 = vld [vmem:[%s1742_s13 + $0x90] sm:$0xff]  ;;  %p1498_p9 = pnand %p1497_p7, %p1491_p2 }
  0x64   : > { %1228 = vmatprep.subr.bf16.mxu0 %v1395_v4  ;;  %v371_v40 = vpack.c.bf16 %v348_v38, %v347_v37  ;;  %v350_v42 = vld [vmem:[%s1742_s13 + $0x98] sm:$0xff]  ;;  %v351_v43 = vld [vmem:[%s1742_s13 + $0xa0] sm:$0xff]  ;;  %v352_v44 = vld [vmem:[%s1742_s13 + $0xa8] sm:$0xff] }
  0x65   : > { %v372_v45 = vpack.c.bf16 %v350_v42, %v349_v41  ;;  %v373_v46 = vpack.c.bf16 %v352_v44, %v351_v43  ;;  %v353_v47 = vld [vmem:[%s1742_s13 + $0xb0] sm:$0xff]  ;;  %v354_v48 = vld [vmem:[%s1742_s13 + $0xb8] sm:$0xff]  ;;  %v355_v49 = vld [vmem:[%s1742_s13 + $0xc0] sm:$0xff] }
  0x66   : > { %1275 = vmatpush3.bf16.msra.mxu1 %v1402_v14  ;;  %v356_v50 = vld [vmem:[%s1742_s13 + $0xc8] sm:$0xff]  ;;  %v374_v51 = vpack.c.bf16 %v354_v48, %v353_v47  ;;  %v357_v53 = vld [vmem:[%s1742_s13 + $0xd0] sm:$0xff]  ;;  %v358_v54 = vld [vmem:[%s1742_s13 + $0xd8] sm:$0xff] }
  0x67   : > { %1229 = vmatpush3.bf16.msra.mxu0 %v1395_v4  ;;  %1276 = vmatprep.subr.bf16.mxu1 %v1403_v17  ;;  %v375_v52 = vpack.c.bf16 %v356_v50, %v355_v49  ;;  %v359_v55 = vld [vmem:[%s1742_s13 + $0xe0] sm:$0xff]  ;;  %v360_v56 = vld [vmem:[%s1742_s13 + $0xe8] sm:$0xff]  ;;  %v376_v57 = vpack.c.bf16 %v358_v54, %v357_v53  ;;  %v361_v59 = vld [vmem:[%s1742_s13 + $0xf0] sm:$0xff] }
  0x68   : > { %1230 = vmatprep.subr.bf16.mxu0 %v1396_v8  ;;  %v377_v58 = vpack.c.bf16 %v360_v56, %v359_v55  ;;  %v362_v60 = vld [vmem:[%s1742_s13 + $0xf8] sm:$0xff]  ;;  %v1405_v62 = vld [vmem:[#allocation8 + $0x10] sm:$0xff]   ;;  %v1406_v63 = vld [vmem:[#allocation8 + $0x8] sm:$0xff]   ;;  %s1015_s13 = scalar_lea.sflag [#allocation5], %s1738_s14 }
  0x69   : > { %v378_v61 = vpack.c.bf16 %v362_v60, %v361_v59  ;;  %v1407_v0 = vld [vmem:[#allocation8] sm:$0xff]   ;;  %v1787_v3 = vld [vmem:[%s1933_s2] ss:$0 sm:$0xff] }
  0x6a   : > { %1277 = vmatpush3.bf16.msra.mxu1 %v1403_v17 }
  0x6b   : > { %1231 = vmatpush3.bf16.msra.mxu0 %v1396_v8  ;;  %1278 = vmatprep.subr.bf16.mxu1 %v1404_v22 }
  0x6c   : > { %1232 = vmatprep.subr.bf16.mxu0 %v1397_v9 }
  0x6e   : > { %1279 = vmatpush3.bf16.msra.mxu1 %v1404_v22 }
  0x6f   : > { %1233 = vmatpush3.bf16.msra.mxu0 %v1397_v9  ;;  %1280 = vmatprep.subr.bf16.mxu1 %v1405_v62 }
  0x70   : > { %1234 = vmatprep.subr.bf16.mxu0 %v1398_v10 }
  0x72   : > { %1281 = vmatpush3.bf16.msra.mxu1 %v1405_v62 }
  0x73   : > { %1235 = vmatpush3.bf16.msra.mxu0 %v1398_v10  ;;  %1282 = vmatprep.subr.bf16.mxu1 %v1406_v63 }
  0x74   : > { %1236 = vmatprep.subr.bf16.mxu0 %v1399_v13 }
  0x76   : > { %1283 = vmatpush3.bf16.msra.mxu1 %v1406_v63 }
  0x77   : > { %1237 = vmatpush3.bf16.msra.mxu0 %v1399_v13  ;;  %1284 = vmatprep.subr.bf16.mxu1 %v1407_v0 }
  0x7a   : > { %1239 = vmatmul.mubr.bf16.vlgmr.msra.gmra.mxu0 %v364_v20  ;;  %1285 = vmatpush3.bf16.msra.mxu1 %v1407_v0 }
  0x7b   : > { %1242 = vmatprep.mubr.bf16.mxu0 %v365_v21 }
  0x82   : > { %1243 = vmatmul.mubr.bf16.gmra.mxu0 %v366_v27 }
  0x83   : > { %1246 = vmatprep.mubr.bf16.mxu0 %v367_v28 }
  0x8a   : > { %1247 = vmatmul.mubr.bf16.gmra.mxu0 %v368_v33 }
  0x8b   : > { %1250 = vmatprep.mubr.bf16.mxu0 %v369_v34 }
  0x92   : > { %1251 = vmatmul.mubr.bf16.gmra.mxu0 %v370_v39 }
  0x93   : > { %1254 = vmatprep.mubr.bf16.mxu0 %v371_v40 }
  0x9a   : > { %1255 = vmatmul.mubr.bf16.gmra.mxu0 %v372_v45 }
  0x9b   : > { %1258 = vmatprep.mubr.bf16.mxu0 %v373_v46 }
  0xa2   : > { %1259 = vmatmul.mubr.bf16.gmra.mxu0 %v374_v51 }
  0xa3   : > { %1262 = vmatprep.mubr.bf16.mxu0 %v375_v52 }
  0xaa   : > { %1263 = vmatmul.mubr.bf16.gmra.mxu0 %v376_v57 }
  0xab   : > { %1266 = vmatprep.mubr.bf16.mxu0 %v377_v58 }
  0xb2   : > { %1267 = vmatmul.mubr.bf16.gmra.mxu0 %v378_v61 }
 0x13a   : > { %v1240_v1 = vpop.f32.mrf.mxu0 }
 0x13b   : > { %v493_v7 = vadd.f32 %v1240_v1, %v1787_v3 }
 0x13c   : > { %v484_v2 = vpop.f32.mrf.mxu0 }
 0x13d   : > { %v485_v5 = vadd.f32 %v1787_v3, %v484_v2  ;;  %v613_v14 = vmax.f32 %v493_v7, 0.0 }
 0x13e   : > { %v1241_v4 = vpop.f32.mrf.mxu0 }
 0x13f   : > { %v496_v6 = vadd.f32 %v1241_v4, %v1787_v3  ;;  %v611_v12 = vmax.f32 %v485_v5, 0.0 }
 0x140   : > { %v487_v8 = vpop.f32.mrf.mxu0 }
 0x141   : > { %v488_v9 = vadd.f32 %v1787_v3, %v487_v8  ;;  %v614_v10 = vmax.f32 %v496_v6, 0.0 }
 0x142   : > { %v1244_v11 = vpop.f32.mrf.mxu0 }
 0x143   : > { %v612_v13 = vmax.f32 %v488_v9, 0.0  ;;  %v644_v17 = vpack.c.bf16 %v614_v10, %v613_v14  ;;  %v509_v21 = vadd.f32 %v1244_v11, %v1787_v3 }
 0x144   : > { %v500_v15 = vpop.f32.mrf.mxu0 }
 0x145   : > { %v643_v16 = vpack.c.bf16 %v612_v13, %v611_v12  ;;  %v501_v19 = vadd.f32 %v1787_v3, %v500_v15  ;;  %v617_v28 = vmax.f32 %v509_v21, 0.0 }
 0x146   : > { %v1245_v18 = vpop.f32.mrf.mxu0 }
 0x147   : > { %v512_v20 = vadd.f32 %v1245_v18, %v1787_v3  ;;  %1286 = vmatprep.mubr.bf16.mxu1 %v643_v16  ;;  %v615_v26 = vmax.f32 %v501_v19, 0.0 }
 0x148   : > { %v503_v22 = vpop.f32.mrf.mxu0  ;;  %1287 = vmatmul.mubr.bf16.vlgmr.msra.gmra.mxu1 %v644_v17 }
 0x149   : > { %v504_v23 = vadd.f32 %v1787_v3, %v503_v22  ;;  %v618_v24 = vmax.f32 %v512_v20, 0.0 }
 0x14a   : > { %v1248_v25 = vpop.f32.mrf.mxu0 }
 0x14b   : > { %v616_v27 = vmax.f32 %v504_v23, 0.0  ;;  %v646_v31 = vpack.c.bf16 %v618_v24, %v617_v28  ;;  %v525_v35 = vadd.f32 %v1248_v25, %v1787_v3 }
 0x14c   : > { %v516_v29 = vpop.f32.mrf.mxu0 }
 0x14d   : > { %v645_v30 = vpack.c.bf16 %v616_v27, %v615_v26  ;;  %v517_v33 = vadd.f32 %v1787_v3, %v516_v29  ;;  %v621_v42 = vmax.f32 %v525_v35, 0.0 }
 0x14e   : > { %v1249_v32 = vpop.f32.mrf.mxu0 }
 0x14f   : > { %v528_v34 = vadd.f32 %v1249_v32, %v1787_v3  ;;  %1290 = vmatprep.mubr.bf16.mxu1 %v645_v30  ;;  %v619_v40 = vmax.f32 %v517_v33, 0.0 }
 0x150   : > { %v519_v36 = vpop.f32.mrf.mxu0  ;;  %1291 = vmatmul.mubr.bf16.gmra.mxu1 %v646_v31 }
 0x151   : > { %v520_v37 = vadd.f32 %v1787_v3, %v519_v36  ;;  %v622_v38 = vmax.f32 %v528_v34, 0.0 }
 0x152   : > { %v1252_v39 = vpop.f32.mrf.mxu0 }
 0x153   : > { %v620_v41 = vmax.f32 %v520_v37, 0.0  ;;  %v648_v45 = vpack.c.bf16 %v622_v38, %v621_v42  ;;  %v541_v49 = vadd.f32 %v1252_v39, %v1787_v3 }
 0x154   : > { %v532_v43 = vpop.f32.mrf.mxu0 }
 0x155   : > { %v647_v44 = vpack.c.bf16 %v620_v41, %v619_v40  ;;  %v533_v47 = vadd.f32 %v1787_v3, %v532_v43  ;;  %v625_v56 = vmax.f32 %v541_v49, 0.0 }
 0x156   : > { %v1253_v46 = vpop.f32.mrf.mxu0 }
 0x157   : > { %v544_v48 = vadd.f32 %v1253_v46, %v1787_v3  ;;  %1294 = vmatprep.mubr.bf16.mxu1 %v647_v44  ;;  %v623_v54 = vmax.f32 %v533_v47, 0.0 }
 0x158   : > { %v535_v50 = vpop.f32.mrf.mxu0  ;;  %1295 = vmatmul.mubr.bf16.gmra.mxu1 %v648_v45 }
 0x159   : > { %v536_v51 = vadd.f32 %v1787_v3, %v535_v50  ;;  %v626_v52 = vmax.f32 %v544_v48, 0.0 }
 0x15a   : > { %v1256_v53 = vpop.f32.mrf.mxu0 }
 0x15b   : > { %v624_v55 = vmax.f32 %v536_v51, 0.0  ;;  %v650_v59 = vpack.c.bf16 %v626_v52, %v625_v56  ;;  %v557_v63 = vadd.f32 %v1256_v53, %v1787_v3  ;;  %v1824_v51 = vld [vmem:[%s1936_s5] sm:$0x1] }
 0x15c   : > { %v548_v57 = vpop.f32.mrf.mxu0  ;;  %1220 = vmatprep.mubr.bf16.mxu0 %v1824_v51 }
 0x15d   : > { %v649_v58 = vpack.c.bf16 %v624_v55, %v623_v54  ;;  %v549_v61 = vadd.f32 %v1787_v3, %v548_v57  ;;  %v629_v7 = vmax.f32 %v557_v63, 0.0  ;;  %v940_v55 = vld [vmem:[#allocation2] sm:$0x1]  ;;  %v1565_v57 = vmov 0  }
 0x15e   : > { %v1257_v60 = vpop.f32.mrf.mxu0  ;;  %1391 = vset.pattern.permute.xlu0 %v1565_v57 }
 0x15f   : > { %v560_v62 = vadd.f32 %v1257_v60, %v1787_v3  ;;  %1298 = vmatprep.mubr.bf16.mxu1 %v649_v58  ;;  %v627_v5 = vmax.f32 %v549_v61, 0.0  ;;  %943 = vperm.xlu0 %1391, %v940_v55  }
 0x160   : > { %v551_v0 = vpop.f32.mrf.mxu0  ;;  %1299 = vmatmul.mubr.bf16.gmra.mxu1 %v650_v59 }
 0x161   : > { %v552_v1 = vadd.f32 %v1787_v3, %v551_v0  ;;  %v630_v2 = vmax.f32 %v560_v62, 0.0 }
 0x162   : > { %v1260_v4 = vpop.f32.mrf.mxu0 }
 0x163   : > { %v628_v6 = vmax.f32 %v552_v1, 0.0  ;;  %v652_v10 = vpack.c.bf16 %v630_v2, %v629_v7  ;;  %v573_v14 = vadd.f32 %v1260_v4, %v1787_v3 }
 0x164   : > { %v564_v8 = vpop.f32.mrf.mxu0 }
 0x165   : > { %v651_v9 = vpack.c.bf16 %v628_v6, %v627_v5  ;;  %v565_v12 = vadd.f32 %v1787_v3, %v564_v8  ;;  %v633_v21 = vmax.f32 %v573_v14, 0.0 }
 0x166   : > { %v1261_v11 = vpop.f32.mrf.mxu0 }
 0x167   : > { %v576_v13 = vadd.f32 %v1261_v11, %v1787_v3  ;;  %1302 = vmatprep.mubr.bf16.mxu1 %v651_v9  ;;  %v631_v19 = vmax.f32 %v565_v12, 0.0 }
 0x168   : > { %v567_v15 = vpop.f32.mrf.mxu0  ;;  %1303 = vmatmul.mubr.bf16.gmra.mxu1 %v652_v10 }
 0x169   : > { %v568_v16 = vadd.f32 %v1787_v3, %v567_v15  ;;  %v634_v17 = vmax.f32 %v576_v13, 0.0 }
 0x16a   : > { %v1264_v18 = vpop.f32.mrf.mxu0 }
 0x16b   : > { %v632_v20 = vmax.f32 %v568_v16, 0.0  ;;  %v654_v24 = vpack.c.bf16 %v634_v17, %v633_v21  ;;  %v589_v28 = vadd.f32 %v1264_v18, %v1787_v3 }
 0x16c   : > { %v580_v22 = vpop.f32.mrf.mxu0 }
 0x16d   : > { %v653_v23 = vpack.c.bf16 %v632_v20, %v631_v19  ;;  %v581_v26 = vadd.f32 %v1787_v3, %v580_v22  ;;  %v637_v35 = vmax.f32 %v589_v28, 0.0 }
 0x16e   : > { %v1265_v25 = vpop.f32.mrf.mxu0 }
 0x16f   : > { %v592_v27 = vadd.f32 %v1265_v25, %v1787_v3  ;;  %1306 = vmatprep.mubr.bf16.mxu1 %v653_v23  ;;  %v635_v33 = vmax.f32 %v581_v26, 0.0 }
 0x170   : > { %v583_v29 = vpop.f32.mrf.mxu0  ;;  %1307 = vmatmul.mubr.bf16.gmra.mxu1 %v654_v24 }
 0x171   : > { %v584_v30 = vadd.f32 %v1787_v3, %v583_v29  ;;  %v638_v31 = vmax.f32 %v592_v27, 0.0 }
 0x172   : > { %v1268_v32 = vpop.f32.mrf.mxu0 }
 0x173   : > { %v636_v34 = vmax.f32 %v584_v30, 0.0  ;;  %v656_v38 = vpack.c.bf16 %v638_v31, %v637_v35  ;;  %v605_v42 = vadd.f32 %v1268_v32, %v1787_v3 }
 0x174   : > { %v596_v36 = vpop.f32.mrf.mxu0 }
 0x175   : > { %v655_v37 = vpack.c.bf16 %v636_v34, %v635_v33  ;;  %v597_v40 = vadd.f32 %v1787_v3, %v596_v36  ;;  %v641_v48 = vmax.f32 %v605_v42, 0.0 }
 0x176   : > { %v1269_v39 = vpop.f32.mrf.mxu0 }
 0x177   : > { %v608_v41 = vadd.f32 %v1269_v39, %v1787_v3  ;;  %1310 = vmatprep.mubr.bf16.mxu1 %v655_v37  ;;  %v639_v46 = vmax.f32 %v597_v40, 0.0 }
 0x178   : > { %v599_v43 = vpop.f32.mrf.mxu0  ;;  %1311 = vmatmul.mubr.bf16.gmra.mxu1 %v656_v38 }
 0x179   : > { %v600_v44 = vadd.f32 %v1787_v3, %v599_v43  ;;  %v642_v45 = vmax.f32 %v608_v41, 0.0  ;;  %v1830_v3 = vld [vmem:[%s1935_s4] ss:$0 sm:$0xff] }
 0x17b   : > { %v640_v47 = vmax.f32 %v600_v44, 0.0  ;;  %v658_v50 = vpack.c.bf16 %v642_v45, %v641_v48 }
 0x17d   : > { %v657_v49 = vpack.c.bf16 %v640_v47, %v639_v46 }
 0x17f   : > { %1314 = vmatprep.mubr.bf16.mxu1 %v657_v49 }
 0x180   : > { %1315 = vmatmul.mubr.bf16.gmra.mxu1 %v658_v50 }
 0x208   : > { %v1288_v52 = vpop.f32.mrf.mxu1 }
 0x209   : > { %v773_v54 = vadd.f32 %v1288_v52, %v1830_v3 }
 0x20a   : > { %v764_v53 = vpop.f32.mrf.mxu1 }
 0x20b   : > { %v765_v58 = vadd.f32 %v1830_v3, %v764_v53  ;;  %v893_v61 = vmax.f32 %v773_v54, 0.0 }
 0x20c   : > { %v1289_v56 = vpop.f32.mrf.mxu1 }
 0x20d   : > { %v776_v59 = vadd.f32 %v1289_v56, %v1830_v3  ;;  %v891_v1 = vmax.f32 %v765_v58, 0.0 }
 0x20e   : > { %v767_v60 = vpop.f32.mrf.mxu1 }
 0x20f   : > { %v894_v62 = vmax.f32 %v776_v59, 0.0  ;;  %v768_v63 = vadd.f32 %v1830_v3, %v767_v60 }
 0x210   : > { %v1292_v0 = vpop.f32.mrf.mxu1 }
 0x211   : > { %v1836_v2 = vpack.c.bf16 %v894_v62, %v893_v61  ;;  %v892_v4 = vmax.f32 %v768_v63, 0.0  ;;  %v789_v7 = vadd.f32 %v1292_v0, %v1830_v3 }
 0x212   : > { %v780_v5 = vpop.f32.mrf.mxu1 }
 0x213   : > { %v1838_v6 = vpack.c.bf16 %v892_v4, %v891_v1  ;;  %v781_v9 = vadd.f32 %v1830_v3, %v780_v5  ;;  %v897_v12 = vmax.f32 %v789_v7, 0.0 }
 0x214   : > { %v1293_v8 = vpop.f32.mrf.mxu1 }
 0x215   : > { %v792_v10 = vadd.f32 %v1293_v8, %v1830_v3  ;;  %v895_v16 = vmax.f32 %v781_v9, 0.0 }
 0x216   : > { %v783_v11 = vpop.f32.mrf.mxu1 }
 0x217   : > { %v898_v13 = vmax.f32 %v792_v10, 0.0  ;;  %v784_v14 = vadd.f32 %v1830_v3, %v783_v11 }
 0x218   : > { %v1844_v15 = vpop.f32.mrf.mxu1 }
 0x219   : > { %v1846_v17 = vpack.c.bf16 %v898_v13, %v897_v12  ;;  %v896_v18 = vmax.f32 %v784_v14, 0.0 }
 0x21a   : > { %v1848_v19 = vpop.f32.mrf.mxu1 }
 0x21b   : > { %v1850_v20 = vpack.c.bf16 %v896_v18, %v895_v16 }
 0x21c   : > { %v1297_v21 = vpop.f32.mrf.mxu1 }
 0x21d   : > { %v808_v18 = vadd.f32 %v1297_v21, %v1830_v3 }
 0x21e   : > { %v1852_v22 = vpop.f32.mrf.mxu1 }
 0x220   : > { %v1300_v23 = vpop.f32.mrf.mxu1 }
 0x221   : > { %v821_v54 = vadd.f32 %v1300_v23, %v1830_v3 }
 0x222   : > { %v812_v24 = vpop.f32.mrf.mxu1 }
 0x223   : > { %v905_v63 = vmax.f32 %v821_v54, 0.0  ;;  %v813_v10 = vadd.f32 %v1830_v3, %v812_v24 }
 0x224   : > { %v1301_v25 = vpop.f32.mrf.mxu1 }
 0x225   : > { %v824_v50 = vadd.f32 %v1301_v25, %v1830_v3  ;;  %v903_v14 = vmax.f32 %v813_v10, 0.0 }
 0x226   : > { %v815_v26 = vpop.f32.mrf.mxu1 }
 0x227   : > { %v906_v58 = vmax.f32 %v824_v50, 0.0  ;;  %v816_v7 = vadd.f32 %v1830_v3, %v815_v26  ;;  %v944_v50 = vpop.permute.xlu0 %943 }
 0x228   : > { %v1304_v27 = vpop.f32.mrf.mxu1 }
 0x229   : > { %v837_v29 = vadd.f32 %v1304_v27, %v1830_v3  ;;  %v931_v5 = vpack.c.bf16 %v906_v58, %v905_v63  ;;  %v904_v12 = vmax.f32 %v816_v7, 0.0  ;;  %v805_v27 = vadd.f32 %v1844_v15, %v1830_v3 }
 0x22a   : > { %v828_v28 = vpop.f32.mrf.mxu1 }
 0x22b   : > { %v829_v31 = vadd.f32 %v1830_v3, %v828_v28  ;;  %v909_v34 = vmax.f32 %v837_v29, 0.0  ;;  %v930_v23 = vpack.c.bf16 %v904_v12, %v903_v14  ;;  %v902_v28 = vmax.f32 %v808_v18, 0.0 }
 0x22c   : > { %v1305_v30 = vpop.f32.mrf.mxu1 }
 0x22d   : > { %v840_v32 = vadd.f32 %v1305_v30, %v1830_v3  ;;  %v907_v38 = vmax.f32 %v829_v31, 0.0  ;;  %v901_v30 = vmax.f32 %v805_v27, 0.0 }
 0x22e   : > { %v831_v33 = vpop.f32.mrf.mxu1 }
 0x22f   : > { %v910_v35 = vmax.f32 %v840_v32, 0.0  ;;  %v832_v36 = vadd.f32 %v1830_v3, %v831_v33  ;;  %v929_v32 = vpack.c.bf16 %v902_v28, %v901_v30  ;;  %v800_v33 = vadd.f32 %v1830_v3, %v1852_v22 }
 0x230   : > { %v1308_v37 = vpop.f32.mrf.mxu1 }
 0x231   : > { %v1858_v39 = vpack.c.bf16 %v910_v35, %v909_v34  ;;  %v908_v40 = vmax.f32 %v832_v36, 0.0  ;;  %v797_v35 = vadd.f32 %v1830_v3, %v1848_v19  ;;  %v853_v15 = vadd.f32 %v1308_v37, %v1830_v3 }
 0x232   : > { %v1860_v41 = vpop.f32.mrf.mxu1  ;;  %v900_v36 = vmax.f32 %v800_v33, 0.0 }
 0x233   : > { %v1862_v42 = vpack.c.bf16 %v908_v40, %v907_v38  ;;  %v899_v40 = vmax.f32 %v797_v35, 0.0  ;;  %v845_v22 = vadd.f32 %v1830_v3, %v1860_v41 }
 0x234   : > { %v1309_v43 = vpop.f32.mrf.mxu1 }
 0x235   : > { %v856_v21 = vadd.f32 %v1309_v43, %v1830_v3 }
 0x236   : > { %v847_v44 = vpop.f32.mrf.mxu1 }
 0x237   : > { %v914_v38 = vmax.f32 %v856_v21, 0.0 }
 0x238   : > { %v1312_v45 = vpop.f32.mrf.mxu1 }
 0x239   : > { %v869_v11 = vadd.f32 %v1312_v45, %v1830_v3  ;;  %v913_v45 = vmax.f32 %v853_v15, 0.0 }
 0x23a   : > { %v860_v46 = vpop.f32.mrf.mxu1 }
 0x23b   : > { %v917_v16 = vmax.f32 %v869_v11, 0.0  ;;  %v861_v24 = vadd.f32 %v1830_v3, %v860_v46  ;;  %v928_v46 = vpack.c.bf16 %v900_v36, %v899_v40 }
 0x23c   : > { %v1313_v47 = vpop.f32.mrf.mxu1 }
 0x23d   : > { %v872_v8 = vadd.f32 %v1313_v47, %v1830_v3  ;;  %v915_v31 = vmax.f32 %v861_v24, 0.0  ;;  %v935_v47 = vpack.c.bf16 %v914_v38, %v913_v45 }
 0x23e   : > { %v863_v48 = vpop.f32.mrf.mxu1 }
 0x23f   : > { %v918_v13 = vmax.f32 %v872_v8, 0.0  ;;  %v864_v26 = vadd.f32 %v1830_v3, %v863_v48  ;;  %v848_v48 = vadd.f32 %v1830_v3, %v847_v44  ;;  %v1566_v44 = vmov 1966171168  }
 0x240   : > { %v1316_v49 = vpop.f32.mrf.mxu1 }
 0x241   : > { %v885_v53 = vadd.f32 %v1316_v49, %v1830_v3  ;;  %v937_v25 = vpack.c.bf16 %v918_v13, %v917_v16  ;;  %v916_v29 = vmax.f32 %v864_v26, 0.0  ;;  %v912_v43 = vmax.f32 %v848_v48, 0.0 }
 0x242   : > { %v876_v52 = vpop.f32.mrf.mxu1  ;;  %v911_v49 = vmax.f32 %v845_v22, 0.0 }
 0x243   : > { %v877_v56 = vadd.f32 %v1830_v3, %v876_v52  ;;  %v921_v60 = vmax.f32 %v885_v53, 0.0  ;;  %v936_v34 = vpack.c.bf16 %v916_v29, %v915_v31 }
 0x244   : > { %v1317_v55 = vpop.f32.mrf.mxu1  ;;  %v934_v19 = vpack.c.bf16 %v912_v43, %v911_v49 }
 0x245   : > { %v888_v57 = vadd.f32 %v1317_v55, %v1830_v3  ;;  %v919_v0 = vmax.f32 %v877_v56, 0.0 }
 0x246   : > { %v879_v59 = vpop.f32.mrf.mxu1 }
 0x247   : > { %v922_v61 = vmax.f32 %v888_v57, 0.0  ;;  %v880_v62 = vadd.f32 %v1830_v3, %v879_v59  ;;  %v946_v3 = vlaneseq }
 0x249   : > { %v939_v1 = vpack.c.bf16 %v922_v61, %v921_v60  ;;  %v920_v4 = vmax.f32 %v880_v62, 0.0  ;;  %v947_v37 = vshrl.u32 %v946_v3, 7  ;;  %vm1011_vm0 = vcmp.lt.s32.totalorder %v946_v3, 256 }
 0x24b   : > { %v938_v9 = vpack.c.bf16 %v920_v4, %v919_v0  ;;  %1204 = vmatprep.subr.bf16.mxu0 %v939_v1  ;;  %v948_v41 = vsub.s32 0, %v947_v37 }
 0x24c   : > { %1205 = vmatpush3.bf16.xpose.msra.mxu0 %v931_v5 }
 0x24d   : > { %1206 = vmatprep.subr.bf16.mxu0 %v938_v9  ;;  %v949_v52 = vrot.slane %v944_v50, %v948_v41 }
 0x254   : > { %1207 = vmatpush3.bf16.xpose.msra.mxu0 %v930_v23 }
 0x255   : > { %1208 = vmatprep.subr.bf16.mxu0 %v937_v25 }
 0x25c   : > { %1209 = vmatpush3.bf16.xpose.msra.mxu0 %v929_v32 }
 0x25d   : > { %1210 = vmatprep.subr.bf16.mxu0 %v936_v34 }
 0x264   : > { %1211 = vmatpush3.bf16.xpose.msra.mxu0 %v928_v46 }
 0x265   : > { %1212 = vmatprep.subr.bf16.mxu0 %v935_v47 }
 0x26c   : > { %1213 = vmatpush3.bf16.xpose.msra.mxu0 %v1846_v17  ;;  %v995_v17 = vunpack.c.l.s4 %v1566_v44 }
 0x26d   : > { %1214 = vmatprep.subr.bf16.mxu0 %v934_v19 }
 0x26e   : > { %v996_v53 = vunpack.c.0.s8 %v995_v17 }
 0x274   : > { %1215 = vmatpush3.bf16.xpose.msra.mxu0 %v1850_v20 }
 0x275   : > { %1216 = vmatprep.subr.bf16.mxu0 %v1858_v39 }
 0x27c   : > { %1217 = vmatpush3.bf16.xpose.msra.mxu0 %v1836_v2 }
 0x27d   : > { %1218 = vmatprep.subr.bf16.mxu0 %v1862_v42  ;;  %v999_v42 = vsub.s32 %v996_v53, %v947_v37 }
 0x284   : > { %1219 = vmatpush3.bf16.xpose.msra.mxu0 %v1838_v6 }
 0x28b   : > { %1221 = vmatmul.mubr.bf16.vlgmr.msra.gmra.mxu0 %v1824_v51 }
 0x34b   : > { %v984_v20 = vpop.f32.mrf.mxu0 }
 0x34c   : > { %v985_v2 = vadd.f32 %v984_v20, %v949_v52 }
 0x34d   : > { %v986_v39 = vpop.f32.mrf.mxu0 }
 0x34e   : > { %v987_v54 = vadd.f32 %v986_v39, %v949_v52 }
 0x34f   : > { %v988_v6 = vpop.f32.mrf.mxu0 }
 0x350   : > { %v993_v55 = vcombine.low %v985_v2, %v987_v54 }
 0x351   : > { %v989_v51 = vpop.f32.mrf.mxu0 }
 0x352   : > { %v1000_v56 = vrot.slane %v993_v55, %v999_v42 }
 0x354   : > { %v1007_v57 = vrot.slane %v1000_v56, %v999_v42 }
 0x356   : > { %1013 = vst.msk [vmem:[%s327_s25] sm:$0x3] %vm1011_vm0, %v1007_v57 }
 0x357   : > { %1501 = shalt.err (!%p1498_p9)
}
 0x358   : > { %s1502_s20 = scalar_lea.hbm %s1027_s16, 32  ;;  %s1506_s22 = scalar_lea.hbm %s1938_s7, 64 }
 0x359   : > { %p1503_p13 = scmp.ne.s32.totalorder %s1027_s16, %s1502_s20  ;;  %p1507_p4 = scmp.lt.s32.totalorder %s1027_s16, %s1938_s7 }
 0x35a   : > { %p1508_p8 = scmp.lt.s32.totalorder %s1506_s22, %s1502_s20 }
 0x35b   : > { %p1504_p5 = pnand %p1503_p13, %p1954_p10 }
 0x35c   : > { %p1509_p3 = por %p1508_p8, %p1507_p4 }
 0x35d   : > { %p1505_p0 = pneg %p1504_p5 }
 0x35f   : > { %p1510_p11 = pnand %p1509_p3, %p1505_p0 }
 0x361   : > { %1513 = shalt.err (!%p1510_p11)
}
 0x362   : > { %1328 = dma.vmem_to_hbm [thread:$0]  (%p1954_p10), %s1030_s23, 32, %s1027_s16, %s1015_s13  }
 0x363 PF: > { %s1041_s25 = sand.u32 1, %s1544_s26   ;;  %p1955_p1 = scmp.ne.s32.totalorder %s1944_s9, 0 }
 0x364   : > { %p1956_p2 = scmp.ge.s32.totalorder %s1556_s29, 2  ;;  %s1042_s30 = scalar_lea.sflag [#allocation5], %s1041_s25 }
 0x366   : > { %p1342_p6 = pnand %p1956_p2, %p1955_p1 }
 0x368   : > { %p1343_p12 = pneg %p1342_p6 }
 0x36a   : > { %1539 = dma.done.wait (%p1343_p12), %s1042_s30, 32  }
 0x36b   : > { %1541 = vsyncadd (%p1343_p12), %s1042_s30, 4294967264  ;;  %p23_p7 = scmp.ge.s32.totalorder %s1683_s24, 4   ;;  %s1957_s26 = smov %s1548_s27 }
 0x36c   : > { %s1958_s27 = smov %s1552_s28  ;;  %s1959_s28 = smov %s1699_s12 }
 0x36d   : > { %s1960_s29 = smov %s1683_s24  ;;  %25 = sbr.rel (!%p23_p7) target bundleno = 9 (0x9), region = 101 }
 0x372   :  { %1047 = vsyncpa [#allocation4], 1 }
 0x373   :  { %1049 = vsyncpa [#allocation4 + $0x1], 1 }
 0x374   :  { %1050 = vsyncpa [#allocation7], 1 }
 0x375   :  { %1051 = vsyncpa [#allocation5], 1 }
 0x376   :  { %1053 = vsyncpa [#allocation5 + $0x1], 1 }

</bundles_post_ra>
